<compile_context>
chip_gen: v5e
topology: v5e:2x2
jax: 0.10.0
libtpu: 0.0.40
codegen_flags: <defaults>
</compile_context>

<pallas_src>
import functools

import jax
import jax.numpy as jnp
from jax.experimental import pallas as pl
from jax.experimental.pallas import tpu as pltpu


def _gen_loss_kernel(x_ref, *rest, tiles_per_slice, num_tiles, tile_rows,
                     acc_rows, valid_last_rows, inv_n, has_weight, needs_mask,
                     guard_tail):
    if has_weight:
        w_ref, out_ref, acc_ref = rest
    else:
        out_ref, acc_ref = rest
        w_ref = None

    c = pl.program_id(0)            # slice axis ("parallel" -> megacore on v7x)
    j = pl.program_id(1)            # row-tile axis within a slice ("arbitrary")
    t = c * tiles_per_slice + j     # global row-tile index
    last = num_tiles - 1

    @pl.when(j == 0)
    def _():
        acc_ref[...] = jnp.zeros(acc_ref.shape, acc_ref.dtype)

    def accumulate(mask_rows):
        x = x_ref[...].astype(jnp.float32)
        # Numerically stable softplus(-x) = max(-x, 0) + log1p(exp(-|x|)).
        contrib = jnp.maximum(-x, 0.0) + jnp.log1p(jnp.exp(-jnp.abs(x)))
        if mask_rows is not None:
            row_ids = jax.lax.broadcasted_iota(jnp.int32, contrib.shape, 0)
            contrib = jnp.where(row_ids < mask_rows, contrib, 0.0)
        if acc_rows != tile_rows:
            # Fold sublane groups so the accumulator stays (8, lanes):
            # pure vreg-wise VALU adds, no per-vreg accumulator load/store.
            contrib = contrib.reshape(tile_rows // acc_rows, acc_rows, -1).sum(axis=0)
        acc_ref[...] += contrib

    if needs_mask:
        @pl.when(t < last)
        def _():
            accumulate(None)                 # hot path: no mask work

        @pl.when(t == last)
        def _():
            accumulate(valid_last_rows)      # ragged final tile only
    elif guard_tail:
        @pl.when(t <= last)
        def _():
            accumulate(None)                 # skip the dead padding tile
    else:
        accumulate(None)

    @pl.when(j == tiles_per_slice - 1)
    def _():
        acc = acc_ref[...]
        if has_weight:
            # Weight is constant over rows: apply once to the per-lane sums.
            acc = acc * w_ref[...].astype(jnp.float32)
        partial = jnp.sum(acc) * jnp.float32(inv_n)
        out_ref[...] = jnp.zeros(out_ref.shape, jnp.float32) + partial


def _choose_lanes(n):
    """Lane width for the flattened (weight=None) case: a divisor of n that is a
    multiple of 128 and (when possible) leaves at least 8 rows of sublanes."""
    cap = min(n, 8192)
    row8_cap = min(cap, max(1, n // 8))
    best_128 = None
    best_any = None
    best_any_small = None
    for l in range(cap, 0, -1):
        if n % l:
            continue
        if best_any is None:
            best_any = l
        if l <= row8_cap:
            if l % 128 == 0:
                return l
            if best_any_small is None:
                best_any_small = l
        elif l % 128 == 0 and best_128 is None:
            best_128 = l
    return best_any_small or best_128 or best_any or n


def non_saturating_logistic_generator_loss(prediction_fake, weight=None, *,
                                           target_block_bytes=4 * 1024 * 1024,
                                           num_slices=2):
    """mean(softplus(-prediction_fake) [* broadcast(weight)]) via a Pallas kernel."""
    pred = prediction_fake
    n_elements = int(pred.size)

    if weight is not None:
        h, w = weight.shape[-2], weight.shape[-1]
        if pred.ndim < 2 or pred.shape[-2:] != (h, w):
            raise ValueError("weight spatial dims must match prediction's last two dims")
        if int(weight.size) != h * w:
            raise ValueError("weight must contain exactly H*W elements (no batch dims)")
        lanes = h * w
        w2 = weight.reshape(1, lanes)
    else:
        lanes = _choose_lanes(n_elements)
        w2 = None

    rows = n_elements // lanes
    x2 = pred.reshape(rows, lanes)

    # Row-tile sizing: as big as fits ~target_block_bytes, multiple of 8 (or full extent).
    bytes_per_row = max(lanes * x2.dtype.itemsize, 1)
    rows_cap = max(8, (target_block_bytes // bytes_per_row) // 8 * 8)
    tile_rows = rows if rows <= rows_cap else rows_cap
    num_tiles = -(-rows // tile_rows)
    needs_mask = (rows % tile_rows) != 0
    valid_last_rows = rows - (num_tiles - 1) * tile_rows

    # Split the row-tiles into slices along a leading "parallel" axis (2 TCs on v7x).
    ns = max(1, min(int(num_slices), num_tiles))
    tiles_per_slice = -(-num_tiles // ns)
    guard_tail = (ns * tiles_per_slice) != num_tiles

    acc_rows = 8 if (tile_rows % 8 == 0 and tile_rows > 8) else tile_rows

    kernel = functools.partial(
        _gen_loss_kernel,
        tiles_per_slice=tiles_per_slice,
        num_tiles=num_tiles,
        tile_rows=tile_rows,
        acc_rows=acc_rows,
        valid_last_rows=valid_last_rows,
        inv_n=1.0 / float(n_elements),
        has_weight=weight is not None,
        needs_mask=needs_mask,
        guard_tail=guard_tail,
    )

    last_tile = num_tiles - 1

    def x_index_map(c, j):
        # Clamp the dead padding step (if any) onto the last real tile: same
        # block index as the previous step -> no extra DMA, and the kernel body
        # skips its accumulation via pl.when.
        return (jnp.minimum(c * tiles_per_slice + j, last_tile), 0)

    in_specs = [pl.BlockSpec((tile_rows, lanes), x_index_map)]
    args = [x2]
    if w2 is not None:
        in_specs.append(pl.BlockSpec((1, lanes), lambda c, j: (0, 0)))
        args.append(w2)

    weight_bytes = lanes * w2.dtype.itemsize if w2 is not None else 0
    cost = pl.CostEstimate(
        flops=6 * n_elements,
        transcendentals=2 * n_elements,   # exp + log1p per element
        bytes_accessed=n_elements * x2.dtype.itemsize + weight_bytes + ns * 8 * 128 * 4,
    )

    out = pl.pallas_call(
        kernel,
        out_shape=jax.ShapeDtypeStruct((ns * 8, 128), jnp.float32),
        grid_spec=pltpu.PrefetchScalarGridSpec(
            num_scalar_prefetch=0,
            grid=(ns, tiles_per_slice),
            in_specs=in_specs,
            out_specs=pl.BlockSpec((8, 128), lambda c, j: (c, 0)),
            scratch_shapes=[pltpu.VMEM((acc_rows, lanes), jnp.float32)],
        ),
        compiler_params=pltpu.CompilerParams(
            dimension_semantics=("parallel", "arbitrary"),
            vmem_limit_bytes=32 * 1024 * 1024,
        ),
        cost_estimate=cost,
    )(*args)

    # One lane-dense (8,128) block per slice, each filled with that slice's partial.
    return jnp.sum(out[0::8, 0])


if __name__ == "__main__":
    key = jax.random.PRNGKey(0)
    k_pred, k_w, k_big = jax.random.split(key, 3)

    # 5-D discriminator prediction (B, C, T, H, W), matching the weight.view(1,1,1,H,W) usage.
    B, C, T, H, W = 2, 4, 3, 16, 16
    prediction_fake = jax.random.normal(k_pred, (B, C, T, H, W), dtype=jnp.float32)
    weight = jax.random.uniform(k_w, (H, W), dtype=jnp.float32)

    def check(got, ref, tol):
        got = float(jax.block_until_ready(got))
        ref = float(ref)
        assert abs(got - ref) < tol * max(1.0, abs(ref)), (got, ref)

    # Weighted path.
    loss_weighted = jax.jit(non_saturating_logistic_generator_loss)(prediction_fake, weight)
    ref_weighted = jnp.mean(jax.nn.softplus(-prediction_fake) * weight.reshape(1, 1, 1, H, W))
    check(loss_weighted, ref_weighted, 1e-5)

    # Plain (weight=None) path.
    loss_plain = jax.jit(lambda p: non_saturating_logistic_generator_loss(p))(prediction_fake)
    ref_plain = jnp.mean(jax.nn.softplus(-prediction_fake))
    check(loss_plain, ref_plain, 1e-5)

    # Multi-tile / two-slice / ragged-final-tile path (forced via tiny row tiles).
    pred_big = jax.random.normal(k_big, (3, 5, 7, H, W), dtype=jnp.float32)
    loss_tiled = jax.jit(functools.partial(non_saturating_logistic_generator_loss,
                                           target_block_bytes=16 * 1024))(pred_big, weight)
    ref_tiled = jnp.mean(jax.nn.softplus(-pred_big) * weight.reshape(1, 1, 1, H, W))
    check(loss_tiled, ref_tiled, 5e-5)

    print("KERNEL_OK")
</pallas_src>

<mosaic_0001>
module attributes {stable_mosaic.version = 11 : i64} {
  func.func @_gen_loss_kernel(%arg0: i32, %arg1: i32, %arg2: memref<24x256xf32, #tpu.memory_space<vmem>>, %arg3: memref<1x256xf32, #tpu.memory_space<vmem>>, %arg4: memref<8x128xf32, #tpu.memory_space<vmem>>, %arg5: memref<8x256xf32, #tpu.memory_space<vmem>>) attributes {dimension_semantics = [#tpu.dimension_semantics<parallel>, #tpu.dimension_semantics<arbitrary>], iteration_bounds = array<i64: 1, 1>, scalar_prefetch = 0 : i64, scratch_operands = 1 : i64, tpu.core_type = #tpu.core_type<tc>, window_params = [{transform_indices = @transform_0, window_bounds = array<i64: 24, 256>}, {pipeline_mode = #tpu.pipeline_mode<synchronous>, transform_indices = @transform_1, window_bounds = array<i64: 1, 256>}, {transform_indices = @transform_2, window_bounds = array<i64: 8, 128>}]} {
    %c0_i32 = arith.constant 0 : i32
    %0 = arith.cmpi eq, %arg1, %c0_i32 : i32
    %1 = arith.extui %0 : i1 to i32
    %c0_i32_0 = arith.constant 0 : i32
    %2 = arith.cmpi ne, %1, %c0_i32_0 : i32
    scf.if %2 {
      %cst_11 = arith.constant 0.000000e+00 : f32
      %22 = vector.broadcast %cst_11 : f32 to vector<8x256xf32>
      %c0_12 = arith.constant 0 : index
      %c0_13 = arith.constant 0 : index
      %23 = vector.load %arg5[%c0_12, %c0_13] : memref<8x256xf32, #tpu.memory_space<vmem>>, vector<8x256xf32>
      tpu.vector_store %arg5[%c0_12, %c0_13], %22 {strides = array<i32>} : memref<8x256xf32, #tpu.memory_space<vmem>>, vector<8x256xf32>,
    } else {
    }
    %c0 = arith.constant 0 : index
    %c0_1 = arith.constant 0 : index
    %3 = vector.load %arg2[%c0, %c0_1] : memref<24x256xf32, #tpu.memory_space<vmem>>, vector<24x256xf32>
    %cst = arith.constant 0.000000e+00 : f32
    %4 = vector.broadcast %cst : f32 to vector<24x256xf32>
    %5 = arith.subf %4, %3 : vector<24x256xf32>
    %cst_2 = arith.constant 0.000000e+00 : f32
    %6 = vector.broadcast %cst_2 : f32 to vector<24x256xf32>
    %7 = arith.maximumf %5, %6 : vector<24x256xf32>
    %8 = math.absf %3 : vector<24x256xf32>
    %cst_3 = arith.constant 0.000000e+00 : f32
    %9 = vector.broadcast %cst_3 : f32 to vector<24x256xf32>
    %10 = arith.subf %9, %8 : vector<24x256xf32>
    %11 = math.exp %10 : vector<24x256xf32>
    %12 = math.log1p %11 : vector<24x256xf32>
    %13 = arith.addf %7, %12 : vector<24x256xf32>
    %14 = vector.shape_cast %13 : vector<24x256xf32> to vector<3x8x256xf32>
    %cst_4 = arith.constant dense<0.000000e+00> : vector<8x256xf32>
    %15 = vector.multi_reduction <add>, %14, %cst_4 [0] : vector<3x8x256xf32> to vector<8x256xf32>
    %c0_5 = arith.constant 0 : index
    %c0_6 = arith.constant 0 : index
    %16 = vector.load %arg5[%c0_5, %c0_6] : memref<8x256xf32, #tpu.memory_space<vmem>>, vector<8x256xf32>
    %17 = arith.addf %16, %15 : vector<8x256xf32>
    %c0_7 = arith.constant 0 : index
    %c0_8 = arith.constant 0 : index
    %18 = vector.load %arg5[%c0_7, %c0_8] : memref<8x256xf32, #tpu.memory_space<vmem>>, vector<8x256xf32>
    tpu.vector_store %arg5[%c0_7, %c0_8], %17 {strides = array<i32>} : memref<8x256xf32, #tpu.memory_space<vmem>>, vector<8x256xf32>,
    %c0_i32_9 = arith.constant 0 : i32
    %19 = arith.cmpi eq, %arg1, %c0_i32_9 : i32
    %20 = arith.extui %19 : i1 to i32
    %c0_i32_10 = arith.constant 0 : i32
    %21 = arith.cmpi ne, %20, %c0_i32_10 : i32
    scf.if %21 {
      %c0_11 = arith.constant 0 : index
      %c0_12 = arith.constant 0 : index
      %22 = vector.load %arg5[%c0_11, %c0_12] : memref<8x256xf32, #tpu.memory_space<vmem>>, vector<8x256xf32>
      %c0_13 = arith.constant 0 : index
      %c0_14 = arith.constant 0 : index
      %23 = vector.load %arg3[%c0_13, %c0_14] : memref<1x256xf32, #tpu.memory_space<vmem>>, vector<1x256xf32>
      %24 = vector.broadcast %23 : vector<1x256xf32> to vector<8x256xf32>
      %25 = arith.mulf %22, %24 : vector<8x256xf32>
      %26 = vector.shape_cast %25 : vector<8x256xf32> to vector<1x8x256xf32>
      %cst_15 = arith.constant dense<0.000000e+00> : vector<1xf32>
      %27 = vector.multi_reduction <add>, %26, %cst_15 [1, 2] : vector<1x8x256xf32> to vector<1xf32>
      %28 = vector.shape_cast %27 : vector<1xf32> to vector<1x1x1xf32>
      %29 = vector.extract %28[0, 0, 0] : f32 from vector<1x1x1xf32>
      %cst_16 = arith.constant 1.62760422E-4 : f32
      %30 = arith.mulf %29, %cst_16 : f32
      %cst_17 = arith.constant 0.000000e+00 : f32
      %31 = vector.broadcast %cst_17 : f32 to vector<8x128xf32>
      %32 = vector.broadcast %30 : f32 to vector<8x128xf32>
      %33 = arith.addf %31, %32 : vector<8x128xf32>
      %c0_18 = arith.constant 0 : index
      %c0_19 = arith.constant 0 : index
      %34 = vector.load %arg4[%c0_18, %c0_19] : memref<8x128xf32, #tpu.memory_space<vmem>>, vector<8x128xf32>
      tpu.vector_store %arg4[%c0_18, %c0_19], %33 {strides = array<i32>} : memref<8x128xf32, #tpu.memory_space<vmem>>, vector<8x128xf32>,
    } else {
    }
    return
  }
  func.func @transform_0(%arg0: i32, %arg1: i32) -> (i32, i32) {
    %c1_i32 = arith.constant 1 : i32
    %0 = arith.muli %arg0, %c1_i32 : i32
    %1 = arith.addi %0, %arg1 : i32
    %c0_i32 = arith.constant 0 : i32
    %2 = arith.minsi %1, %c0_i32 : i32
    %c0_i32_0 = arith.constant 0 : i32
    %c0_i32_1 = arith.constant 0 : i32
    return %2, %c0_i32_0 : i32, i32
  }
  func.func @transform_1(%arg0: i32, %arg1: i32) -> (i32, i32) {
    %c0_i32 = arith.constant 0 : i32
    %c0_i32_0 = arith.constant 0 : i32
    %c0_i32_1 = arith.constant 0 : i32
    return %c0_i32, %c0_i32_0 : i32, i32
  }
  func.func @transform_2(%arg0: i32, %arg1: i32) -> (i32, i32) {
    %c0_i32 = arith.constant 0 : i32
    %c0_i32_0 = arith.constant 0 : i32
    return %arg0, %c0_i32 : i32, i32
  }
}

</mosaic_0001>

<bundles_post_ra>
// kernel: non_saturating_logistic_generator_loss.1
= control target key start
LH: loop header
LB: loop body
LE: loop exit
PB: predicated region body
PF: predicated region fallthrough
CT: control target
= control target key end

     0   :  { %s300_s0 = inlined_call_operand.vmem [shape: f32[24,256], index: 0, kind: input, shape index: {}]   ;;  %s301_s1 = inlined_call_operand.vmem [shape: f32[1,256], index: 1, kind: input, shape index: {}]   ;;  %s302_s2 = inlined_call_operand.vmem [shape: f32[8,128], index: 2, kind: output, shape index: {}]  }
   0x1   :  { %v52_v0 = vld [vmem:[%s300_s0] sm:$0xff]  ;;  %v53_v1 = vld [vmem:[%s300_s0 + $0x8] sm:$0xff]  ;;  %v54_v2 = vld [vmem:[%s300_s0 + $0x10] sm:$0xff] }
   0x2   :  { %v55_v3 = vld [vmem:[%s300_s0 + $0x18] sm:$0xff]  ;;  %v257_v4 = vld [vmem:[%s300_s0 + $0x20] sm:$0xff]  ;;  %v262_v5 = vld [vmem:[%s300_s0 + $0x28] sm:$0xff]  ;;  %v70_v6 = vand.u32 2147483647, %v52_v0  ;;  %v58_v24 = vsub.f32 0.0, %v52_v0 }
   0x3   :  { %v71_v7 = vand.u32 2147483647, %v53_v1  ;;  %v72_v8 = vand.u32 2147483647, %v54_v2  ;;  %v73_v9 = vand.u32 2147483647, %v55_v3 }
   0x4   :  { %v74_v10 = vand.u32 2147483647, %v257_v4  ;;  %v75_v11 = vand.u32 2147483647, %v262_v5  ;;  %v76_v12 = vsub.f32 0.0, %v70_v6  ;;  %v59_v26 = vsub.f32 0.0, %v53_v1 }
   0x5   :  { %v77_v13 = vsub.f32 0.0, %v71_v7  ;;  %v78_v14 = vsub.f32 0.0, %v72_v8  ;;  %v79_v15 = vsub.f32 0.0, %v73_v9  ;;  %v60_v28 = vsub.f32 0.0, %v54_v2 }
   0x6   :  { %v80_v16 = vsub.f32 0.0, %v74_v10  ;;  %v81_v17 = vsub.f32 0.0, %v75_v11  ;;  %v82_v18 = vmul.f32 1.442695, %v76_v12  ;;  %v61_v29 = vsub.f32 0.0, %v55_v3 }
   0x7   :  { %v84_v19 = vmul.f32 1.442695, %v77_v13  ;;  %v86_v20 = vmul.f32 1.442695, %v78_v14  ;;  %v88_v21 = vmul.f32 1.442695, %v79_v15 }
   0x8   :  { %203 = vpow2.f32 %v82_v18  ;;  %v90_v22 = vmul.f32 1.442695, %v80_v16  ;;  %v92_v23 = vmul.f32 1.442695, %v81_v17  ;;  %v62_v33 = vsub.f32 0.0, %v257_v4 }
   0x9   :  { %205 = vpow2.f32 %v84_v19  ;;  %v63_v34 = vsub.f32 0.0, %v262_v5  ;;  %v64_v38 = vmax.f32 %v58_v24, 0.0  ;;  %v65_v45 = vmax.f32 %v59_v26, 0.0 }
   0xa   :  { %207 = vpow2.f32 %v86_v20  ;;  %v66_v46 = vmax.f32 %v60_v28, 0.0  ;;  %v67_v49 = vmax.f32 %v61_v29, 0.0  ;;  %v169_v29 = vld [vmem:[%s301_s1] sm:$0x3] }
   0xb   :  { %209 = vpow2.f32 %v88_v21 }
   0xc   :  { %211 = vpow2.f32 %v90_v22 }
   0xd   :  { %213 = vpow2.f32 %v92_v23  ;;  %v68_v23 = vmax.f32 %v62_v33, 0.0 }
   0xe   :  { %v204_v25 = vpop.eup %203 }
   0xf   :  { %v206_v27 = vpop.eup %205  ;;  %v94_v30 = vadd.f32 1.0, %v204_v25  ;;  %v97_v31 = vmul.f32 -0.5, %v204_v25  ;;  %v100_v39 = vand.u32 2147483647, %v204_v25 }
  0x10   :  { %v208_v32 = vpop.eup %207  ;;  %v103_v35 = vadd.f32 1.0, %v206_v27  ;;  %v106_v36 = vmul.f32 -0.5, %v206_v27  ;;  %v109_v50 = vand.u32 2147483647, %v206_v27 }
  0x11   :  { %v210_v37 = vpop.eup %209  ;;  %215 = vlog2.f32 %v94_v30  ;;  %v112_v40 = vadd.f32 1.0, %v208_v32  ;;  %v98_v42 = vadd.f32 1.0, %v97_v31  ;;  %v115_v44 = vmul.f32 -0.5, %v208_v32 }
  0x12   :  { %v212_v41 = vpop.eup %211  ;;  %217 = vlog2.f32 %v103_v35  ;;  %v107_v43 = vadd.f32 1.0, %v106_v36  ;;  %v121_v47 = vadd.f32 1.0, %v210_v37  ;;  %v124_v52 = vmul.f32 -0.5, %v210_v37 }
  0x13   :  { %219 = vlog2.f32 %v112_v40  ;;  %v214_v48 = vpop.eup %213  ;;  %v116_v51 = vadd.f32 1.0, %v115_v44  ;;  %v118_v53 = vand.u32 2147483647, %v208_v32  ;;  %v130_v54 = vadd.f32 1.0, %v212_v41 }
  0x14   :  { %221 = vlog2.f32 %v121_v47  ;;  %v133_v55 = vmul.f32 -0.5, %v212_v41  ;;  %v99_v56 = vmul.f32 %v204_v25, %v98_v42  ;;  %vm268_vm0 = vcmp.lt.f32.partialorder %v100_v39, 0.0004427343 }
  0x15   :  { %v108_v58 = vmul.f32 %v206_v27, %v107_v43  ;;  %v125_v59 = vadd.f32 1.0, %v124_v52  ;;  %v127_v61 = vand.u32 2147483647, %v210_v37  ;;  %223 = vlog2.f32 %v130_v54 }
  0x16   :  { %v139_v62 = vadd.f32 1.0, %v214_v48  ;;  %v142_v63 = vmul.f32 -0.5, %v214_v48  ;;  %vm272_vm1 = vcmp.lt.f32.partialorder %v109_v50, 0.0004427343  ;;  %v117_v3 = vmul.f32 %v208_v32, %v116_v51 }
  0x17   :  { %v216_v60 = vpop.eup %215  ;;  %v134_v4 = vadd.f32 1.0, %v133_v55  ;;  %vm276_vm2 = vcmp.lt.f32.partialorder %v118_v53, 0.0004427343  ;;  %v136_v9 = vand.u32 2147483647, %v212_v41  ;;  %v126_v12 = vmul.f32 %v210_v37, %v125_v59 }
  0x18   :  { %v218_v0 = vpop.eup %217  ;;  %v96_v1 = vmul.f32 0.6931472, %v216_v60  ;;  %225 = vlog2.f32 %v139_v62  ;;  %v143_v13 = vadd.f32 1.0, %v142_v63  ;;  %vm284_vm3 = vcmp.lt.f32.partialorder %v127_v61, 0.0004427343 }
  0x19   :  { %v220_v6 = vpop.eup %219  ;;  %v105_v7 = vmul.f32 0.6931472, %v218_v0  ;;  %v145_v17 = vand.u32 2147483647, %v214_v48  ;;  %v135_v21 = vmul.f32 %v212_v41, %v134_v4  ;;  %vm137_vm4 = vcmp.lt.f32.partialorder %v136_v9, 0.0004427343 }
  0x1a   :  { %v102_v10 = vsel %vm268_vm0, %v99_v56, %v96_v1  ;;  %v114_v11 = vmul.f32 0.6931472, %v220_v6  ;;  %v222_v14 = vpop.eup %221  ;;  %v144_v28 = vmul.f32 %v214_v48, %v143_v13  ;;  %v69_v31 = vmax.f32 %v63_v34, 0.0 }
  0x1b   :  { %v111_v15 = vsel %vm272_vm1, %v108_v58, %v105_v7  ;;  %v148_v18 = vadd.f32 %v102_v10, %v64_v38  ;;  %v123_v20 = vmul.f32 0.6931472, %v222_v14  ;;  %v224_v22 = vpop.eup %223  ;;  %vm146_vm5 = vcmp.lt.f32.partialorder %v145_v17, 0.0004427343 }
  0x1c   :  { %v120_v19 = vsel %vm276_vm2, %v117_v3, %v114_v11  ;;  %v149_v24 = vadd.f32 %v111_v15, %v65_v45  ;;  %v132_v27 = vmul.f32 0.6931472, %v224_v22  ;;  %v171_v39 = vperm.slane %v169_v29, 0 }
  0x1d   :  { %v150_v25 = vadd.f32 %v120_v19, %v66_v46  ;;  %v129_v26 = vsel %vm284_vm3, %v126_v12, %v123_v20  ;;  %v172_v43 = vperm.slane %v169_v29, 1 }
  0x1e   :  { %v226_v30 = vpop.eup %225  ;;  %v151_v32 = vadd.f32 %v129_v26, %v67_v49  ;;  %v138_v33 = vsel %vm137_vm4, %v135_v21, %v132_v27 }
  0x1f   :  { %v154_v35 = vadd.f32 %v150_v25, %v148_v18  ;;  %v141_v36 = vmul.f32 0.6931472, %v226_v30  ;;  %v152_v37 = vadd.f32 %v138_v33, %v68_v23 }
  0x20   :  { %v156_v38 = vadd.f32 %v151_v32, %v149_v24 }
  0x21   :  { %v147_v40 = vsel %vm146_vm5, %v144_v28, %v141_v36  ;;  %v155_v42 = vadd.f32 %v154_v35, %v152_v37 }
  0x22   :  { %v153_v41 = vadd.f32 %v147_v40, %v69_v31 }
  0x23   :  { %v175_v45 = vmul.f32 %v171_v39, %v155_v42 }
  0x24   :  { %v157_v44 = vadd.f32 %v156_v38, %v153_v41 }
  0x26   :  { %v176_v46 = vmul.f32 %v172_v43, %v157_v44 }
  0x28   :  { %v177_v47 = vadd.f32 %v176_v46, %v175_v45 }
  0x2a   :  { %178 = vadd.xlane.f32.xlu0 %v177_v47 }
  0x9d   :  { %v179_v48 = vpop.xlane.xlu0 %178 }
  0x9e   :  { %v180_v5 = vrot.slane %v179_v48, 4 }
  0xa0   :  { %v181_v34 = vadd.f32 %v180_v5, %v179_v48 }
  0xa2   :  { %v182_v50 = vrot.slane %v181_v34, 2 }
  0xa4   :  { %v183_v49 = vadd.f32 %v182_v50, %v181_v34 }
  0xa6   :  { %v184_v51 = vrot.slane %v183_v49, 1 }
  0xa8   :  { %v185_v52 = vadd.f32 %v184_v51, %v183_v49 }
  0xaa   :  { %201 = vpush %v185_v52 }
  0xdb   :  { %s202_s1 = spop %201 }
  0xdc   :  { %s187_s22 = smul.f32 0.00016276042, %s202_s1 }
  0xde   :  { %v188_v53 = vstv %s187_s22 }
  0xdf   :  { %190 = vst [vmem:[%s302_s2] sm:$0xff] %v188_v53 }

</bundles_post_ra>
